<compile_context>
chip_gen: v7x
topology: tpu7x:2x2x1
jax: 0.10.0
libtpu: 0.0.40
codegen_flags: <defaults>
</compile_context>

<pallas_src>
import functools
import math

import jax
import jax.numpy as jnp
from jax.experimental import pallas as pl
from jax.experimental.pallas import tpu as pltpu


# ----------------------------------------------------------------------------
# Helpers usable inside kernels
# ----------------------------------------------------------------------------
def _layernorm(x, g, b):
    mean = jnp.mean(x, axis=-1, keepdims=True)
    var = jnp.mean(jnp.square(x - mean), axis=-1, keepdims=True)
    return (x - mean) * jax.lax.rsqrt(var + 1e-12) * g + b


# ----------------------------------------------------------------------------
# Pallas kernels
# ----------------------------------------------------------------------------
def _embed_ln_kernel(x_ref, g_ref, b_ref, o_ref):
    o_ref[0] = _layernorm(x_ref[0], g_ref[...], b_ref[...])


def _bert_layer_kernel(x_ref, bias_ref, wqkv_ref, bqkv_ref, wo_ref, bo_ref,
                       ln1_g_ref, ln1_b_ref, wi_ref, bi_ref, wo2_ref, bo2_ref,
                       ln2_g_ref, ln2_b_ref, o_ref, *, nheads):
    """One full BERT encoder layer for one sentence (grid axis = batch)."""
    x = x_ref[0]                                   # (S, H) f32
    s_len, hidden = x.shape
    hd = hidden // nheads
    scale = jnp.float32(1.0 / math.sqrt(hd))

    # Fused QKV projection: single MXU call, bf16 inputs, f32 accumulation.
    qkv = jnp.dot(x.astype(jnp.bfloat16), wqkv_ref[...],
                  preferred_element_type=jnp.float32) + bqkv_ref[...]  # (S, 3H)

    bias = bias_ref[0]                             # (1, S) additive mask bias

    # Per-head attention; output projection accumulated per head
    # (ctx @ Wo == sum_h ctx_h @ Wo[h*hd:(h+1)*hd, :], avoids lane concat).
    attn = jnp.zeros((s_len, hidden), jnp.float32)
    for h in range(nheads):
        q = qkv[:, h * hd:(h + 1) * hd]
        k = qkv[:, hidden + h * hd:hidden + (h + 1) * hd]
        v = qkv[:, 2 * hidden + h * hd:2 * hidden + (h + 1) * hd]
        scores = jax.lax.dot_general(                       # q @ k^T, no transpose
            q.astype(jnp.bfloat16), k.astype(jnp.bfloat16),
            (((1,), (1,)), ((), ())),
            preferred_element_type=jnp.float32) * scale + bias         # (S, S)
        m = jnp.max(scores, axis=-1, keepdims=True)
        p = jnp.exp(scores - m)
        p = p * pl.reciprocal(jnp.sum(p, axis=-1, keepdims=True), approx=True)
        ctx = jnp.dot(p.astype(jnp.bfloat16), v.astype(jnp.bfloat16),
                      preferred_element_type=jnp.float32)              # (S, hd)
        attn = attn + jnp.dot(ctx.astype(jnp.bfloat16),
                              wo_ref[h * hd:(h + 1) * hd, :],
                              preferred_element_type=jnp.float32)
    attn = attn + bo_ref[...]

    h1 = _layernorm(attn + x, ln1_g_ref[...], ln1_b_ref[...])

    ffn = jnp.dot(h1.astype(jnp.bfloat16), wi_ref[...],
                  preferred_element_type=jnp.float32) + bi_ref[...]
    # TODO(synk): HF BERT uses exact erf-GELU; tanh approximation used here.
    ffn = jax.nn.gelu(ffn, approximate=True)
    ffn = jnp.dot(ffn.astype(jnp.bfloat16), wo2_ref[...],
                  preferred_element_type=jnp.float32) + bo2_ref[...]
    o_ref[0] = _layernorm(ffn + h1, ln2_g_ref[...], ln2_b_ref[...])


def _wsd_kernel(meta_ref, text_ref, gloss_ref, score_ref, loss_ref):
    """Batched WSD head: span-mean, gloss scoring, masked cross-entropy.

    meta (SMEM int32, (B,4)): [start, end, label, n_valid] per example.
    text:  (1, S, H)   one sentence's last hidden states
    gloss: (1, maxN, H) padded candidate-gloss CLS embeddings
    """
    b = pl.program_id(0)
    start = meta_ref[b, 0]
    end = meta_ref[b, 1]
    label = meta_ref[b, 2]
    n_valid = meta_ref[b, 3]

    text = text_ref[0]                                             # (S, H)
    s_len = text.shape[0]
    row = jax.lax.broadcasted_iota(jnp.int32, (s_len, 1), 0)
    span = jnp.logical_and(row >= start, row < end).astype(jnp.float32)
    denom = jnp.maximum(jnp.sum(span, axis=0, keepdims=True), 1.0)  # (1,1)
    w = jnp.sum(text * span, axis=0, keepdims=True) / denom         # (1,H)

    gloss = gloss_ref[0]                                            # (maxN, H)
    max_n = gloss.shape[0]
    scores = jax.lax.dot_general(w, gloss, (((1,), (1,)), ((), ())),
                                 preferred_element_type=jnp.float32)  # (1,maxN)

    cand = jax.lax.broadcasted_iota(jnp.int32, (1, max_n), 1)
    valid = cand < n_valid
    masked = jnp.where(valid, scores, jnp.float32(-1e9))
    m = jnp.max(masked, axis=-1, keepdims=True)
    lse = m + jnp.log(jnp.sum(jnp.exp(masked - m), axis=-1, keepdims=True))
    picked = jnp.sum(jnp.where(cand == label, scores, 0.0),
                     axis=-1, keepdims=True)                         # (1,1)

    score_ref[0] = jnp.where(valid, scores, 0.0)
    loss_ref[0] = lse - picked


# ----------------------------------------------------------------------------
# pallas_call wrappers
# ----------------------------------------------------------------------------
def embed_layernorm(emb, g, b):
    B, S, H = emb.shape
    return pl.pallas_call(
        _embed_ln_kernel,
        out_shape=jax.ShapeDtypeStruct((B, S, H), jnp.float32),
        grid_spec=pltpu.PrefetchScalarGridSpec(
            num_scalar_prefetch=0, grid=(B,),
            in_specs=[pl.BlockSpec((1, S, H), lambda i: (i, 0, 0)),
                      pl.BlockSpec((1, H), lambda i: (0, 0)),
                      pl.BlockSpec((1, H), lambda i: (0, 0))],
            out_specs=pl.BlockSpec((1, S, H), lambda i: (i, 0, 0))),
        compiler_params=pltpu.CompilerParams(dimension_semantics=("parallel",)),
    )(emb, g, b)


def bert_layer(x, mask_bias, p, nheads):
    B, S, H = x.shape
    I = p["wi"].shape[1]
    return pl.pallas_call(
        functools.partial(_bert_layer_kernel, nheads=nheads),
        out_shape=jax.ShapeDtypeStruct((B, S, H), jnp.float32),
        grid_spec=pltpu.PrefetchScalarGridSpec(
            num_scalar_prefetch=0, grid=(B,),
            in_specs=[
                pl.BlockSpec((1, S, H), lambda b: (b, 0, 0)),      # x
                pl.BlockSpec((1, 1, S), lambda b: (b, 0, 0)),      # mask bias
                pl.BlockSpec((H, 3 * H), lambda b: (0, 0)),        # wqkv (bf16)
                pl.BlockSpec((1, 3 * H), lambda b: (0, 0)),        # bqkv
                pl.BlockSpec((H, H), lambda b: (0, 0)),            # wo (bf16)
                pl.BlockSpec((1, H), lambda b: (0, 0)),            # bo
                pl.BlockSpec((1, H), lambda b: (0, 0)),            # ln1_g
                pl.BlockSpec((1, H), lambda b: (0, 0)),            # ln1_b
                pl.BlockSpec((H, I), lambda b: (0, 0)),            # wi (bf16)
                pl.BlockSpec((1, I), lambda b: (0, 0)),            # bi
                pl.BlockSpec((I, H), lambda b: (0, 0)),            # wo2 (bf16)
                pl.BlockSpec((1, H), lambda b: (0, 0)),            # bo2
                pl.BlockSpec((1, H), lambda b: (0, 0)),            # ln2_g
                pl.BlockSpec((1, H), lambda b: (0, 0)),            # ln2_b
            ],
            out_specs=pl.BlockSpec((1, S, H), lambda b: (b, 0, 0))),
        compiler_params=pltpu.CompilerParams(dimension_semantics=("parallel",)),
    )(x, mask_bias, p["wqkv"], p["bqkv"], p["wo"], p["bo"],
      p["ln1_g"], p["ln1_b"], p["wi"], p["bi"], p["wo2"], p["bo2"],
      p["ln2_g"], p["ln2_b"])


# ----------------------------------------------------------------------------
# Mini-BERT encoder (deterministically initialized, not pretrained)
# ----------------------------------------------------------------------------
def init_bert_params(key, vocab, max_pos, hidden, inter, n_layers):
    def normal(k, shape):
        return 0.02 * jax.random.normal(k, shape, jnp.float32)

    keys = jax.random.split(key, 4 + n_layers)
    params = {
        "tok_emb": normal(keys[0], (vocab, hidden)),
        "pos_emb": normal(keys[1], (max_pos, hidden)),
        "typ_emb": normal(keys[2], (2, hidden)),
        "emb_ln_g": jnp.ones((1, hidden), jnp.float32),
        "emb_ln_b": jnp.zeros((1, hidden), jnp.float32),
        "layers": [],
    }
    for li in range(n_layers):
        lk = jax.random.split(keys[4 + li], 4)
        params["layers"].append({
            # fused QKV weight, stored bf16 for the MXU; biases/LN stay f32
            "wqkv": normal(lk[0], (hidden, 3 * hidden)).astype(jnp.bfloat16),
            "bqkv": jnp.zeros((1, 3 * hidden), jnp.float32),
            "wo": normal(lk[1], (hidden, hidden)).astype(jnp.bfloat16),
            "bo": jnp.zeros((1, hidden), jnp.float32),
            "ln1_g": jnp.ones((1, hidden), jnp.float32),
            "ln1_b": jnp.zeros((1, hidden), jnp.float32),
            "wi": normal(lk[2], (hidden, inter)).astype(jnp.bfloat16),
            "bi": jnp.zeros((1, inter), jnp.float32),
            "wo2": normal(lk[3], (inter, hidden)).astype(jnp.bfloat16),
            "bo2": jnp.zeros((1, hidden), jnp.float32),
            "ln2_g": jnp.ones((1, hidden), jnp.float32),
            "ln2_b": jnp.zeros((1, hidden), jnp.float32),
        })
    return params


def bert_encode(params, token_ids, mask, nheads):
    B, S = token_ids.shape
    # TODO(synk): token_type ids hard-coded to segment 0 (no sentence/gloss pair ids).
    emb = (params["tok_emb"][token_ids]
           + params["pos_emb"][:S][None, :, :]
           + params["typ_emb"][0][None, None, :])
    x = embed_layernorm(emb, params["emb_ln_g"], params["emb_ln_b"])
    # additive attention-mask bias, computed once per forward (hoisted out of layers)
    mask_bias = ((1.0 - mask.astype(jnp.float32)) * jnp.float32(-1e9)).reshape(B, 1, S)
    for layer in params["layers"]:
        x = bert_layer(x, mask_bias, layer, nheads)
    return x  # last_hidden_state, i.e. BertModel(...)[0]


# ----------------------------------------------------------------------------
# BertForWSD.forward equivalent
# ----------------------------------------------------------------------------
def bert_for_wsd_forward(text_params, gloss_params, nheads,
                         sent_token_ids, sent_mask_ids, start_locs, end_locs,
                         sense_token_ids_list, sense_mask_ids_list, labels):
    # TODO(synk): key_list / cached gloss_embedding branch not implemented
    # (requires a precomputed embedding dict loaded from disk).
    text_out = bert_encode(text_params, sent_token_ids, sent_mask_ids, nheads)

    candidate_nums = [int(t.shape[0]) for t in sense_token_ids_list]
    first_locs = [0]
    for n in candidate_nums:
        first_locs.append(first_locs[-1] + n)
    all_sense_tok = jnp.concatenate(sense_token_ids_list, axis=0)
    all_sense_mask = jnp.concatenate(sense_mask_ids_list, axis=0)
    gloss_out = bert_encode(gloss_params, all_sense_tok, all_sense_mask, nheads)
    gloss_cls = gloss_out[:, 0, :]                                  # (total, H)

    B, S, H = text_out.shape
    max_n = max(candidate_nums)
    padded_gloss = jnp.stack([
        jnp.pad(gloss_cls[first_locs[i]:first_locs[i + 1]],
                ((0, max_n - candidate_nums[i]), (0, 0)))
        for i in range(B)])                                         # (B, maxN, H)
    meta = jnp.stack([start_locs.astype(jnp.int32),
                      end_locs.astype(jnp.int32),
                      labels.astype(jnp.int32),
                      jnp.asarray(candidate_nums, jnp.int32)], axis=1)  # (B, 4)

    scores, losses = pl.pallas_call(
        _wsd_kernel,
        out_shape=(jax.ShapeDtypeStruct((B, 1, max_n), jnp.float32),
                   jax.ShapeDtypeStruct((B, 1, 1), jnp.float32)),
        grid_spec=pltpu.PrefetchScalarGridSpec(
            num_scalar_prefetch=1,
            grid=(B,),
            in_specs=[pl.BlockSpec((1, S, H), lambda b, meta: (b, 0, 0)),
                      pl.BlockSpec((1, max_n, H), lambda b, meta: (b, 0, 0))],
            out_specs=(pl.BlockSpec((1, 1, max_n), lambda b, meta: (b, 0, 0)),
                       pl.BlockSpec((1, 1, 1), lambda b, meta: (b, 0, 0)))),
        compiler_params=pltpu.CompilerParams(dimension_semantics=("parallel",)),
    )(meta, text_out, padded_gloss)

    score_list = [scores[i, 0, :candidate_nums[i]].reshape(1, -1) for i in range(B)]
    total_loss = jnp.mean(losses[:, 0, 0])
    return total_loss, score_list


# ----------------------------------------------------------------------------
# Main
# ----------------------------------------------------------------------------
if __name__ == "__main__":
    key = jax.random.PRNGKey(0)
    VOCAB, MAX_POS, HIDDEN, INTER, N_LAYERS, N_HEADS = 100, 16, 32, 64, 2, 2
    B, S = 2, 8

    k_text, k_gloss, k_tok, k_sense0, k_sense1 = jax.random.split(key, 5)
    text_params = init_bert_params(k_text, VOCAB, MAX_POS, HIDDEN, INTER, N_LAYERS)
    gloss_params = init_bert_params(k_gloss, VOCAB, MAX_POS, HIDDEN, INTER, N_LAYERS)

    sent_token_ids = jax.random.randint(k_tok, (B, S), 0, VOCAB, dtype=jnp.int32)
    sent_mask_ids = jnp.array([[1, 1, 1, 1, 1, 1, 1, 1],
                               [1, 1, 1, 1, 1, 1, 0, 0]], dtype=jnp.int32)
    start_locs = jnp.array([1, 2], dtype=jnp.int32)
    end_locs = jnp.array([3, 5], dtype=jnp.int32)
    labels = jnp.array([1, 2], dtype=jnp.int32)

    # example 0 has 3 candidate senses, example 1 has 4 (variable-length list)
    sense_token_ids_list = [
        jax.random.randint(k_sense0, (3, S), 0, VOCAB, dtype=jnp.int32),
        jax.random.randint(k_sense1, (4, S), 0, VOCAB, dtype=jnp.int32),
    ]
    sense_mask_ids_list = [
        jnp.ones((3, S), dtype=jnp.int32),
        jnp.concatenate([jnp.ones((4, S - 2), jnp.int32),
                         jnp.zeros((4, 2), jnp.int32)], axis=1),
    ]

    total_loss, score_list = bert_for_wsd_forward(
        text_params, gloss_params, N_HEADS,
        sent_token_ids, sent_mask_ids, start_locs, end_locs,
        sense_token_ids_list, sense_mask_ids_list, labels)

    total_loss = jax.block_until_ready(total_loss)
    for s in score_list:
        jax.block_until_ready(s)
    assert bool(jnp.isfinite(total_loss))
    assert score_list[0].shape == (1, 3) and score_list[1].shape == (1, 4)
    print("KERNEL_OK")
</pallas_src>

<mosaic_0001>
module attributes {stable_mosaic.version = 11 : i64} {
  func.func @_embed_ln_kernel(%arg0: i32, %arg1: memref<1x8x32xf32, #tpu.memory_space<vmem>>, %arg2: memref<1x32xf32, #tpu.memory_space<vmem>>, %arg3: memref<1x32xf32, #tpu.memory_space<vmem>>, %arg4: memref<1x8x32xf32, #tpu.memory_space<vmem>>) attributes {dimension_semantics = [#tpu.dimension_semantics<parallel>], iteration_bounds = array<i64: 2>, scalar_prefetch = 0 : i64, scratch_operands = 0 : i64, tpu.core_type = #tpu.core_type<tc>, window_params = [{transform_indices = @transform_0, window_bounds = array<i64: 1, 8, 32>}, {pipeline_mode = #tpu.pipeline_mode<synchronous>, transform_indices = @transform_1, window_bounds = array<i64: 1, 32>}, {pipeline_mode = #tpu.pipeline_mode<synchronous>, transform_indices = @transform_2, window_bounds = array<i64: 1, 32>}, {transform_indices = @transform_3, window_bounds = array<i64: 1, 8, 32>}]} {
    %c0 = arith.constant 0 : index
    %c0_0 = arith.constant 0 : index
    %c0_1 = arith.constant 0 : index
    %0 = vector.load %arg1[%c0, %c0_0, %c0_1] : memref<1x8x32xf32, #tpu.memory_space<vmem>>, vector<1x8x32xf32>
    %1 = vector.shape_cast %0 : vector<1x8x32xf32> to vector<8x32xf32>
    %c0_2 = arith.constant 0 : index
    %c0_3 = arith.constant 0 : index
    %2 = vector.load %arg2[%c0_2, %c0_3] : memref<1x32xf32, #tpu.memory_space<vmem>>, vector<1x32xf32>
    %c0_4 = arith.constant 0 : index
    %c0_5 = arith.constant 0 : index
    %3 = vector.load %arg3[%c0_4, %c0_5] : memref<1x32xf32, #tpu.memory_space<vmem>>, vector<1x32xf32>
    %cst = arith.constant dense<0.000000e+00> : vector<8xf32>
    %4 = vector.multi_reduction <add>, %1, %cst [1] : vector<8x32xf32> to vector<8xf32>
    %5 = vector.shape_cast %4 : vector<8xf32> to vector<8x1xf32>
    %cst_6 = arith.constant 3.200000e+01 : f32
    %6 = vector.broadcast %cst_6 : f32 to vector<8x1xf32>
    %7 = arith.divf %5, %6 : vector<8x1xf32>
    %8 = vector.broadcast %7 : vector<8x1xf32> to vector<8x32xf32>
    %9 = arith.subf %1, %8 : vector<8x32xf32>
    %10 = arith.mulf %9, %9 : vector<8x32xf32>
    %cst_7 = arith.constant dense<0.000000e+00> : vector<8xf32>
    %11 = vector.multi_reduction <add>, %10, %cst_7 [1] : vector<8x32xf32> to vector<8xf32>
    %12 = vector.shape_cast %11 : vector<8xf32> to vector<8x1xf32>
    %cst_8 = arith.constant 3.200000e+01 : f32
    %13 = vector.broadcast %cst_8 : f32 to vector<8x1xf32>
    %14 = arith.divf %12, %13 : vector<8x1xf32>
    %15 = vector.broadcast %7 : vector<8x1xf32> to vector<8x32xf32>
    %16 = arith.subf %1, %15 : vector<8x32xf32>
    %cst_9 = arith.constant 9.99999996E-13 : f32
    %17 = vector.broadcast %cst_9 : f32 to vector<8x1xf32>
    %18 = arith.addf %14, %17 : vector<8x1xf32>
    %19 = math.rsqrt %18 : vector<8x1xf32>
    %20 = vector.broadcast %19 : vector<8x1xf32> to vector<8x32xf32>
    %21 = arith.mulf %16, %20 : vector<8x32xf32>
    %22 = vector.broadcast %2 : vector<1x32xf32> to vector<8x32xf32>
    %23 = arith.mulf %21, %22 : vector<8x32xf32>
    %24 = vector.broadcast %3 : vector<1x32xf32> to vector<8x32xf32>
    %25 = arith.addf %23, %24 : vector<8x32xf32>
    %c0_10 = arith.constant 0 : index
    %c0_11 = arith.constant 0 : index
    %c0_12 = arith.constant 0 : index
    %26 = vector.load %arg4[%c0_10, %c0_11, %c0_12] : memref<1x8x32xf32, #tpu.memory_space<vmem>>, vector<1x8x32xf32>
    %27 = vector.shape_cast %26 : vector<1x8x32xf32> to vector<8x32xf32>
    %28 = vector.shape_cast %25 : vector<8x32xf32> to vector<1x8x32xf32>
    tpu.vector_store %arg4[%c0_10, %c0_11, %c0_12], %28 {strides = array<i32>} : memref<1x8x32xf32, #tpu.memory_space<vmem>>, vector<1x8x32xf32>,
    return
  }
  func.func @transform_0(%arg0: i32) -> (i32, i32, i32) {
    %c0_i32 = arith.constant 0 : i32
    %c0_i32_0 = arith.constant 0 : i32
    %c0_i32_1 = arith.constant 0 : i32
    return %arg0, %c0_i32, %c0_i32_0 : i32, i32, i32
  }
  func.func @transform_1(%arg0: i32) -> (i32, i32) {
    %c0_i32 = arith.constant 0 : i32
    %c0_i32_0 = arith.constant 0 : i32
    %c0_i32_1 = arith.constant 0 : i32
    return %c0_i32, %c0_i32_0 : i32, i32
  }
  func.func @transform_2(%arg0: i32) -> (i32, i32) {
    %c0_i32 = arith.constant 0 : i32
    %c0_i32_0 = arith.constant 0 : i32
    %c0_i32_1 = arith.constant 0 : i32
    return %c0_i32, %c0_i32_0 : i32, i32
  }
  func.func @transform_3(%arg0: i32) -> (i32, i32, i32) {
    %c0_i32 = arith.constant 0 : i32
    %c0_i32_0 = arith.constant 0 : i32
    %c0_i32_1 = arith.constant 0 : i32
    return %arg0, %c0_i32, %c0_i32_0 : i32, i32, i32
  }
}

</mosaic_0001>

<bundles_post_ra>
// kernel: tpu_custom_call.1
= control target key start
LH: loop header
LB: loop body
LE: loop exit
PB: predicated region body
PF: predicated region fallthrough
CT: control target
= control target key end

     0   :  { %8 = vsyncpa [#allocation3], 0  ;;  %s655_s0 = inlined_call_operand.hbm [shape: f32[2,8,32], index: 0, kind: input, shape index: {}]   ;;  %s656_s1 = inlined_call_operand.vmem [shape: f32[1,32], index: 1, kind: input, shape index: {}]   ;;  %s657_s2 = inlined_call_operand.vmem [shape: f32[1,32], index: 2, kind: input, shape index: {}]   ;;  %s658_s3 = inlined_call_operand.hbm [shape: f32[2,8,32], index: 3, kind: output, shape index: {}]  }
   0x1   :  { %10 = vsyncpa [#allocation3 + $0x1], 0 }
   0x2   :  { %11 = vsyncpa [#allocation4], 0 }
   0x3   :  { %13 = vsyncpa [#allocation4 + $0x1], 0  ;;  %s485_s12 = smov 0   ;;  %s487_s13 = smov 0  }
   0x4   :  { %s489_s14 = smov 0   ;;  %s491_s15 = smov 0  }
   0x5 LB: > { %s506_s16 = sadd.s32 4294967295, %s461_s15   ;;  %s303_s17 = sadd.s32 4294967294, %s461_s15   ;;  %s461_s15 = sphi %s491_s15, %s673_s15   ;;  %s457_s14 = sphi %s489_s14, %s672_s14   ;;  %s453_s13 = sphi %s487_s13, %s671_s13   ;;  %s449_s12 = sphi %s485_s12, %s670_s12  }
   0x6   : > { %s510_s18 = sadd.s32 1, %s461_s15   ;;  %s26_s19 = sadd.s32 1, %s457_s14 }
   0x7   : > { %s23_s20 = ssub.s32 %s461_s15, %s510_s18  ;;  %p33_p0 = scmp.ne.s32.totalorder %s457_s14, %s453_s13 }
   0x8   : > { %p24_p1 = scmp.eq.s32.totalorder %s23_s20, 0  ;;  %p34_p2 = scmp.eq.s32.totalorder %s461_s15, 0 }
   0x9   : > { %p39_p3 = scmp.ne.s32.totalorder %s453_s13, %s449_s12  ;;  %p40_p4 = scmp.eq.s32.totalorder %s506_s16, 0 }
   0xa   : > { %s522_s21 = scalar_select %p24_p1, %s457_s14, %s26_s19  }
   0xb   : > { %p524_p5 = por %p34_p2, %p33_p0  ;;  %p528_p6 = por %p40_p4, %p39_p3 }
   0xc   : > { %p105_p7 = scmp.eq.s32.totalorder %s506_s16, 1  ;;  %p111_p8 = scmp.eq.s32.totalorder %s303_s17, 1 }
   0xd   : > { %p329_p10 = scmp.lt.s32.totalorder %s461_s15, 2  ;;  %s137_s26 = sand.u32 1, %s457_s14  }
   0xe   : > { %p535_p11 = por %p105_p7, %p33_p0  ;;  %p539_p12 = por %p111_p8, %p39_p3 }
   0xf   : > { %s307_s27 = sshll.u32 %s461_s15, 7  ;;  %s306_s28 = sshll.u32 %s137_s26, 3 }
  0x10   : > { %s662_s24 = scalar_select %p535_p11, 1, 0 }
  0x11   : > { %s663_s25 = scalar_select %p539_p12, 1, 0 }
  0x12   : > { %s548_s4 = scalar_lea.hbm %s655_s0, %s307_s27  ;;  %s141_s5 = scalar_lea.vmem [#allocation2], %s306_s28 }
  0x13   : > { %s148_s6 = sshll.u32 %s141_s5, 4  ;;  %p552_p13 = pnand %p329_p10, %p524_p5  ;;  %s556_s6 = int_to_ptr.vmem [resolvable:$true] %s148_s6 }
  0x14   : > { %s138_s8 = scalar_lea.sflag [#allocation3], %s137_s26  ;;  %s365_s9 = scalar_lea.hbm %s548_s4, 128 }
  0x15   : > { %p366_p2 = scmp.ne.s32.totalorder %s548_s4, %s365_s9  ;;  %p367_p3 = pneg %p552_p13 }
  0x16   : > { %s370_s17 = scalar_lea.hbm %s655_s0, 256  ;;  %p371_p5 = scmp.lt.u32.totalorder %s548_s4, %s655_s0 }
  0x17   : > { %p368_p4 = pnand %p367_p3, %p366_p2  ;;  %p372_p8 = scmp.lt.u32.totalorder %s370_s17, %s365_s9 }
  0x18   : > { %p374_p9 = scmp.lt.u32.totalorder %s365_s9, %s548_s4 }
  0x19   : > { %p369_p7 = pneg %p368_p4  ;;  %p373_p10 = por %p372_p8, %p371_p5 }
  0x1b   : > { %p375_p0 = por %p374_p9, %p373_p10 }
  0x1d   : > { %p376_p1 = pnand %p375_p0, %p369_p7 }
  0x1f   : > { %379 = shalt.err (!%p376_p1)
}
  0x20   : > { %s380_s22 = scalar_lea.vmem %s556_s6, 128  ;;  %s463_s26 = smov [#allocation2]  }
  0x21   : > { %p381_p2 = scmp.ne.s32.totalorder %s556_s6, %s380_s22  ;;  %s385_s27 = sshll.u32 %s463_s26, 4  ;;  %s386_s27 = int_to_ptr.vmem [resolvable:$false] %s385_s27 }
  0x22   : > { %s387_s28 = scalar_lea.vmem %s386_s27, 256  ;;  %p388_p11 = scmp.lt.s32.totalorder %s556_s6, %s386_s27 }
  0x23   : > { %p383_p4 = pnand %p381_p2, %p367_p3  ;;  %p389_p5 = scmp.lt.s32.totalorder %s387_s28, %s380_s22 }
  0x25   : > { %p384_p12 = pneg %p383_p4  ;;  %p390_p8 = por %p389_p5, %p388_p11 }
  0x27   : > { %p391_p9 = pnand %p390_p8, %p384_p12 }
  0x29   : > { %394 = shalt.err (!%p391_p9)
}
  0x2a   : > { %324 = dma.hbm_to_vmem [thread:$0]  (!%p552_p13), %s548_s4, 128, %s556_s6, %s138_s8  }
  0x2b   : > { %p665_p0 = scmp.lt.s32.totalorder %s461_s15, 3  ;;  %p666_p1 = scmp.ge.s32.totalorder %s461_s15, 1 }
  0x2d   : > { %p154_p3 = pnand %p666_p1, %p665_p0 }
  0x2e   : > { %s590_s29 = sand.u32 (!%p154_p3), 1, %s453_s13  }
  0x2f   : > { %157 = sbr.rel (%p154_p3) target bundleno = 383 (0x17f), region = 32  ;;  %s309_s30 = sshll.u32 (!%p154_p3), %s590_s29, 3 }
  0x30   : > { %s160_s5 = scalar_lea.sflag (!%p154_p3), [#allocation3], %s590_s29  ;;  %s163_s9 = scalar_lea.vmem (!%p154_p3), [#allocation2], %s309_s30 }
  0x36   : > { %440 = dma.done.wait (%p528_p6), %s160_s5, 128  }
  0x37   : > { %442 = vsyncadd (%p528_p6), %s160_s5, 4294967168  ;;  %vm189_vm0 = vcmask 261120   ;;  %v186_v0 = vld [vmem:[%s163_s9] sm:$0xff]  ;;  %s314_s8 = sshll.u32 %s506_s16, 7  ;;  %s185_s10 = scalar_lea.vmem [#allocation5], %s309_s30 }
  0x38   : > { %v190_v1 = vsel %vm189_vm0, %v186_v0, 0.0  ;;  %v311_v11 = vld [vmem:[%s656_s1] ss:$0 sm:$0xff]  ;;  %s233_s11 = sshll.u32 %s185_s10, 4  ;;  %s610_s20 = scalar_lea.hbm %s658_s3, %s314_s8  ;;  %s612_s11 = int_to_ptr.vmem [resolvable:$true] %s233_s11 }
  0x39   : > { %191 = vadd.xlane.f32.xlu0 %v190_v1  ;;  %v312_v13 = vld [vmem:[%s657_s2] ss:$0 sm:$0xff]  ;;  %s220_s22 = scalar_lea.sflag [#allocation4], %s590_s29  ;;  %s395_s26 = scalar_lea.vmem %s612_s11, 128 }
  0x3a   : > { %p396_p6 = scmp.ne.s32.totalorder %s612_s11, %s395_s26  ;;  %p667_p11 = scmp.ne.s32.totalorder %s662_s24, 0 }
  0x3b   : > { %s464_s16 = smov [#allocation5]  }
  0x3c   : > { %p397_p12 = pnand %p396_p6, %p667_p11  ;;  %s399_s27 = sshll.u32 %s464_s16, 4  ;;  %s400_s27 = int_to_ptr.vmem [resolvable:$false] %s399_s27 }
  0x3d   : > { %s401_s28 = scalar_lea.vmem %s400_s27, 256  ;;  %p402_p7 = scmp.lt.s32.totalorder %s612_s11, %s400_s27 }
  0x3e   : > { %p398_p13 = pneg %p397_p12  ;;  %p403_p10 = scmp.lt.s32.totalorder %s401_s28, %s395_s26 }
  0x40   : > { %p404_p2 = por %p403_p10, %p402_p7 }
  0x42   : > { %p405_p4 = pnand %p404_p2, %p398_p13 }
  0xc6   : > { %v192_v2 = vpop.xlane.xlu0 %191 }
  0xc7   : > { %v194_v3 = vmul.f32 0.03125, %v192_v2 }
  0xc9   : > { %v195_v4 = vsub.f32 %v186_v0, %v194_v3 }
  0xcb   : > { %v196_v5 = vmul.f32 %v195_v4, %v195_v4 }
  0xcd   : > { %v197_v6 = vsel %vm189_vm0, %v196_v5, 0.0 }
  0xce   : > { %198 = vadd.xlane.f32.xlu0 %v197_v6 }
 0x15b   : > { %v199_v7 = vpop.xlane.xlu0 %198 }
 0x15c   : > { %v200_v8 = vmul.f32 0.03125, %v199_v7 }
 0x15e   : > { %v201_v9 = vadd.f32 1e-12, %v200_v8 }
 0x160   : > { %363 = vrsqrt.f32 %v201_v9 }
 0x16a   : > { %v364_v10 = vpop.eup %363 }
 0x16b   : > { %v203_v12 = vmul.f32 %v364_v10, %v195_v4 }
 0x16d   : > { %v210_v14 = vmul.f32 %v311_v11, %v203_v12 }
 0x16f   : > { %v217_v15 = vadd.f32 %v312_v13, %v210_v14 }
 0x171   : > { %218 = vst.msk [vmem:[%s185_s10] sm:$0xff] %vm189_vm0, %v217_v15 }
 0x172   : > { %408 = shalt.err (!%p405_p4)
}
 0x173   : > { %s409_s29 = scalar_lea.hbm %s610_s20, 128  ;;  %s413_s9 = scalar_lea.hbm %s658_s3, 256 }
 0x174   : > { %p410_p5 = scmp.ne.s32.totalorder %s610_s20, %s409_s29  ;;  %p414_p0 = scmp.lt.u32.totalorder %s610_s20, %s658_s3 }
 0x175   : > { %p415_p1 = scmp.lt.u32.totalorder %s413_s9, %s409_s29  ;;  %p417_p6 = scmp.lt.u32.totalorder %s409_s29, %s610_s20 }
 0x176   : > { %p411_p8 = pnand %p410_p5, %p667_p11 }
 0x177   : > { %p416_p3 = por %p415_p1, %p414_p0 }
 0x178   : > { %p412_p9 = pneg %p411_p8 }
 0x179   : > { %p418_p12 = por %p417_p6, %p416_p3 }
 0x17b   : > { %p419_p13 = pnand %p418_p12, %p412_p9 }
 0x17d   : > { %422 = shalt.err (!%p419_p13)
}
 0x17e   : > { %319 = dma.vmem_to_hbm [thread:$0]  (%p667_p11), %s612_s11, 128, %s610_s20, %s220_s22  }
 0x17f PF: > { %s245_s6 = sand.u32 1, %s449_s12   ;;  %p668_p7 = scmp.ne.s32.totalorder %s663_s25, 0 }
 0x180   : > { %p669_p10 = scmp.ge.s32.totalorder %s461_s15, 2  ;;  %s246_s7 = scalar_lea.sflag [#allocation4], %s245_s6 }
 0x182   : > { %p326_p2 = pnand %p669_p10, %p668_p7 }
 0x184   : > { %444 = dma.done.wait (!%p326_p2), %s246_s7, 128  }
 0x185   : > { %446 = vsyncadd (!%p326_p2), %s246_s7, 4294967168  ;;  %p16_p4 = scmp.ge.s32.totalorder %s510_s18, 4   ;;  %s670_s12 = smov %s453_s13 }
 0x186   : > { %s671_s13 = smov %s457_s14  ;;  %s672_s14 = smov %s522_s21 }
 0x187   : > { %s673_s15 = smov %s510_s18  ;;  %18 = sbr.rel (!%p16_p4) target bundleno = 5 (0x5), region = 77 }
 0x18e   :  { %251 = vsyncpa [#allocation3], 1 }
 0x18f   :  { %253 = vsyncpa [#allocation3 + $0x1], 1 }
 0x190   :  { %254 = vsyncpa [#allocation4], 1 }
 0x191   :  { %256 = vsyncpa [#allocation4 + $0x1], 1 }

</bundles_post_ra>
